<compile_context>
chip_gen: v5e
topology: v5e:2x2
jax: 0.10.0
libtpu: 0.0.40
codegen_flags: <defaults>
</compile_context>

<pallas_src>
import functools

import jax
import jax.numpy as jnp
from jax.experimental import pallas as pl
from jax.experimental.pallas import tpu as pltpu


def _round_up(a: int, b: int) -> int:
    return ((a + b - 1) // b) * b


def _choose_tile(n: int, row_tile: int):
    """Pick (TN, N_pad). Prefer a sublane-aligned TN that divides the
    (sublane-rounded) row count so no row padding / wrapper row-slice copy
    is needed."""
    row_tile = max(8, (row_tile // 8) * 8)
    n8 = _round_up(max(n, 1), 8)
    if n8 <= row_tile:
        return n8, n8
    # Largest multiple of 8 in (row_tile/2, row_tile] that divides n8.
    for cand in range(row_tile, row_tile // 2, -8):
        if n8 % cand == 0:
            return cand, n8
    return row_tile, _round_up(n8, row_tile)


def _gather_logits(ids, table_ref, col):
    """Embedding lookup as one-hot matmul on the MXU.

    Pad rows of the table are zero and never selected (ids < vocab_size), so
    the gather is exact. Precision pinned to HIGHEST so the f32 table is never
    silently truncated to a single bf16 pass.
    """
    onehot = (col == ids).astype(jnp.float32)            # (TN, VP)
    return jnp.dot(onehot, table_ref[...],
                   preferred_element_type=jnp.float32,
                   precision=jax.lax.Precision.HIGHEST)  # (TN, VP)


def _ce_tile_partial(logits, col, tgt, *, vocab_size, n_valid):
    """Per-tile cross-entropy partial sum, returned as a lane-dense (8, VP)
    tile whose total sum equals the sum of this tile's valid per-row losses."""
    tn, vp = logits.shape
    # logsumexp over the *real* vocab lanes only (pad lanes of the zero-padded
    # table would otherwise contribute exp(0) terms).
    masked = jnp.where(col < vocab_size, logits, jnp.float32(-1e30))
    m = jnp.max(masked, axis=-1, keepdims=True)                     # (TN, 1)
    lse = m + jnp.log(jnp.sum(jnp.exp(masked - m), axis=-1, keepdims=True))
    # Each valid row contributes (lse - logit[target]) exactly once (at its
    # target column); padded rows (global index >= n_valid) contribute 0.
    row = jax.lax.broadcasted_iota(jnp.int32, (tn, 1), 0)
    grow = pl.program_id(0) * tn + row                              # (TN, 1)
    contrib = jnp.where((col == tgt) & (grow < n_valid),
                        lse - logits, jnp.float32(0.0))             # (TN, VP)
    part = jnp.sum(contrib, axis=0, keepdims=True)                  # (1, VP)
    r8 = jax.lax.broadcasted_iota(jnp.int32, (8, vp), 0)
    return jnp.where(r8 == 0, part, jnp.float32(0.0))               # (8, VP)


def _logits_kernel(ids_ref, table_ref, logits_ref):
    """ids_ref: (TN,1) i32, table_ref: (VP,VP) f32, logits_ref: (TN,VP) f32."""
    tn, vp = logits_ref.shape
    col = jax.lax.broadcasted_iota(jnp.int32, (tn, vp), 1)
    logits_ref[...] = _gather_logits(ids_ref[:, 0:1], table_ref, col)


def _fused_logits_loss_kernel(idtgt_ref, table_ref, logits_ref, loss_ref, *,
                              vocab_size, n_valid):
    """idtgt_ref: (TN,2) i32 (ids, targets); logits_ref: (TN,VP) f32;
    loss_ref: (1,8,VP) f32 per-tile partial sums."""
    tn, vp = logits_ref.shape
    col = jax.lax.broadcasted_iota(jnp.int32, (tn, vp), 1)
    logits = _gather_logits(idtgt_ref[:, 0:1], table_ref, col)
    logits_ref[...] = logits
    loss_ref[0] = _ce_tile_partial(logits, col, idtgt_ref[:, 1:2],
                                   vocab_size=vocab_size, n_valid=n_valid)


def _loss_only_kernel(idtgt_ref, table_ref, loss_ref, *, vocab_size, n_valid):
    """Loss-only variant: never writes the (TN,VP) logits to HBM."""
    tn = idtgt_ref.shape[0]
    vp = table_ref.shape[1]
    col = jax.lax.broadcasted_iota(jnp.int32, (tn, vp), 1)
    logits = _gather_logits(idtgt_ref[:, 0:1], table_ref, col)
    loss_ref[0] = _ce_tile_partial(logits, col, idtgt_ref[:, 1:2],
                                   vocab_size=vocab_size, n_valid=n_valid)


def bigram_forward(x, targets, table, *, row_tile: int = 2048,
                   compute_logits: bool = True, trim_logits: bool = True):
    """Pallas equivalent of BigramLanguageModel.forward.

    x: (B, T) int token ids; targets: (B, T) int or None; table: (V, V) f32.

    Returns:
      targets given, compute_logits=True : (logits (B*T, V) f32, loss scalar)
      targets given, compute_logits=False: (None, loss scalar)  # no logits HBM writeback
      targets None                       : (logits (B, T, V) f32, None)

    trim_logits=False returns the 128-lane-padded (and possibly row-padded)
    (N_pad, VP) logits directly, skipping the wrapper slice copy.
    row_tile guidance: v5e <= 2048 (16 MiB scoped-VMEM default), v6e 2048-4096,
    v7x 4096+ (3.2 TB/s HBM; 2 TCs share the "parallel" grid axis).
    """
    B, T = x.shape
    V = table.shape[0]
    N = B * T

    VP = _round_up(V, 128)                    # lane-dense padded vocab
    TN, N_pad = _choose_tile(N, row_tile)     # sublane-aligned row tile
    num_tiles = N_pad // TN

    table_p = jnp.pad(table.astype(jnp.float32),
                      ((0, VP - V), (0, VP - V)))                   # (VP, VP)

    table_spec = pl.BlockSpec((VP, VP), lambda i: (0, 0))
    logits_spec = pl.BlockSpec((TN, VP), lambda i: (i, 0))
    loss_spec = pl.BlockSpec((1, 8, VP), lambda i: (i, 0, 0))
    loss_shape = jax.ShapeDtypeStruct((num_tiles, 8, VP), jnp.float32)
    cparams = pltpu.CompilerParams(
        dimension_semantics=("parallel",),
        vmem_limit_bytes=32 * 1024 * 1024)

    if targets is None:
        ids = x.reshape(-1, 1).astype(jnp.int32)
        if N_pad > N:
            ids = jnp.pad(ids, ((0, N_pad - N), (0, 0)))
        cost = pl.CostEstimate(
            flops=2 * N_pad * VP * VP,
            transcendentals=0,
            bytes_accessed=N_pad * 4 + num_tiles * VP * VP * 4 + N_pad * VP * 4)
        logits_p = pl.pallas_call(
            _logits_kernel,
            grid=(num_tiles,),
            in_specs=[pl.BlockSpec((TN, 1), lambda i: (i, 0)), table_spec],
            out_specs=logits_spec,
            out_shape=jax.ShapeDtypeStruct((N_pad, VP), jnp.float32),
            compiler_params=cparams,
            cost_estimate=cost,
        )(ids, table_p)
        if trim_logits:
            return logits_p[:N, :V].reshape(B, T, V), None
        return logits_p, None

    # Pack ids + targets into one (N_pad, 2) i32 array: a single (TN, 2) block
    # instead of two lane-padded (TN, 1) blocks.
    idtgt = jnp.concatenate(
        [x.reshape(-1, 1), targets.reshape(-1, 1)], axis=1).astype(jnp.int32)
    if N_pad > N:
        idtgt = jnp.pad(idtgt, ((0, N_pad - N), (0, 0)))
    idtgt_spec = pl.BlockSpec((TN, 2), lambda i: (i, 0))

    if not compute_logits:
        cost = pl.CostEstimate(
            flops=2 * N_pad * VP * VP,
            transcendentals=N_pad * VP,
            bytes_accessed=(N_pad * 8 + num_tiles * VP * VP * 4
                            + num_tiles * 8 * VP * 4))
        kernel = functools.partial(_loss_only_kernel, vocab_size=V, n_valid=N)
        loss_parts = pl.pallas_call(
            kernel,
            grid=(num_tiles,),
            in_specs=[idtgt_spec, table_spec],
            out_specs=loss_spec,
            out_shape=loss_shape,
            compiler_params=cparams,
            cost_estimate=cost,
        )(idtgt, table_p)
        return None, jnp.sum(loss_parts) / N

    cost = pl.CostEstimate(
        flops=2 * N_pad * VP * VP,
        transcendentals=N_pad * VP,
        bytes_accessed=(N_pad * 8 + num_tiles * VP * VP * 4
                        + N_pad * VP * 4 + num_tiles * 8 * VP * 4))
    kernel = functools.partial(_fused_logits_loss_kernel, vocab_size=V, n_valid=N)
    logits_p, loss_parts = pl.pallas_call(
        kernel,
        grid=(num_tiles,),
        in_specs=[idtgt_spec, table_spec],
        out_specs=(logits_spec, loss_spec),
        out_shape=(jax.ShapeDtypeStruct((N_pad, VP), jnp.float32), loss_shape),
        compiler_params=cparams,
        cost_estimate=cost,
    )(idtgt, table_p)

    loss = jnp.sum(loss_parts) / N
    logits = logits_p[:N, :V] if trim_logits else logits_p
    return logits, loss


if __name__ == "__main__":
    # Config consistent with the module: char-level vocab V=65, B=2, T=8.
    V, B, T = 65, 2, 8
    N = B * T

    key = jax.random.PRNGKey(0)
    k_tab, k_x, k_t = jax.random.split(key, 3)

    # nn.Embedding(V, V) default init: N(0, 1)
    table = jax.random.normal(k_tab, (V, V), dtype=jnp.float32)
    x = jax.random.randint(k_x, (B, T), 0, V, dtype=jnp.int32)
    targets = jax.random.randint(k_t, (B, T), 0, V, dtype=jnp.int32)

    # Training path (fused logits + loss).
    logits, loss = bigram_forward(x, targets, table)
    # Inference path (targets is None) — CE work statically elided.
    logits_inf, loss_none = bigram_forward(x, None, table)
    # Loss-only path — no logits HBM writeback.
    none_logits, loss_only = bigram_forward(x, targets, table,
                                            compute_logits=False)
    jax.block_until_ready((logits, loss, logits_inf, loss_only))

    # Plain-JAX reference (embedding gather + cross-entropy).
    ref_logits = table[x.reshape(-1)]
    ref_lse = jax.scipy.special.logsumexp(ref_logits, axis=-1)
    ref_loss = jnp.mean(ref_lse - ref_logits[jnp.arange(N), targets.reshape(-1)])

    assert logits.shape == (N, V)
    assert logits_inf.shape == (B, T, V) and loss_none is None
    assert none_logits is None
    assert jnp.allclose(logits, ref_logits, atol=1e-5)
    assert jnp.allclose(logits_inf.reshape(N, V), ref_logits, atol=1e-5)
    assert jnp.allclose(loss, ref_loss, atol=1e-5)
    assert jnp.allclose(loss_only, ref_loss, atol=1e-5)

    # Multi-tile + padded-row path: N = 30 with a 16-row tile -> 2 tiles and
    # 2 padded rows in the last tile (exercises the in-kernel row masking).
    B2, T2 = 3, 10
    N2 = B2 * T2
    k_x2, k_t2 = jax.random.split(jax.random.PRNGKey(1), 2)
    x2 = jax.random.randint(k_x2, (B2, T2), 0, V, dtype=jnp.int32)
    t2 = jax.random.randint(k_t2, (B2, T2), 0, V, dtype=jnp.int32)
    logits2, loss2 = bigram_forward(x2, t2, table, row_tile=16)
    _, loss2_only = bigram_forward(x2, t2, table, row_tile=16,
                                   compute_logits=False)
    jax.block_until_ready((logits2, loss2, loss2_only))

    ref_logits2 = table[x2.reshape(-1)]
    ref_lse2 = jax.scipy.special.logsumexp(ref_logits2, axis=-1)
    ref_loss2 = jnp.mean(ref_lse2 - ref_logits2[jnp.arange(N2), t2.reshape(-1)])

    assert logits2.shape == (N2, V)
    assert jnp.allclose(logits2, ref_logits2, atol=1e-5)
    assert jnp.allclose(loss2, ref_loss2, atol=1e-5)
    assert jnp.allclose(loss2_only, ref_loss2, atol=1e-5)

    # TODO(synk): generate() (autoregressive multinomial sampling loop) is host
    # control flow + RNG sampling and is not implemented as a kernel.
    print("KERNEL_OK")
</pallas_src>

<mosaic_0001>
module attributes {stable_mosaic.version = 11 : i64} {
  func.func @_fused_logits_loss_kernel(%arg0: i32, %arg1: memref<16x2xi32, #tpu.memory_space<vmem>>, %arg2: memref<128x128xf32, #tpu.memory_space<vmem>>, %arg3: memref<16x128xf32, #tpu.memory_space<vmem>>, %arg4: memref<1x8x128xf32, #tpu.memory_space<vmem>>) attributes {dimension_semantics = [#tpu.dimension_semantics<parallel>], iteration_bounds = array<i64: 1>, scalar_prefetch = 0 : i64, scratch_operands = 0 : i64, tpu.core_type = #tpu.core_type<tc>, window_params = [{transform_indices = @transform_0, window_bounds = array<i64: 16, 2>}, {pipeline_mode = #tpu.pipeline_mode<synchronous>, transform_indices = @transform_1, window_bounds = array<i64: 128, 128>}, {transform_indices = @transform_2, window_bounds = array<i64: 16, 128>}, {transform_indices = @transform_3, window_bounds = array<i64: 1, 8, 128>}]} {
    %0 = tpu.iota {dimensions = array<i32: 1>} : vector<16x128xi32>
    %c0 = arith.constant 0 : index
    %c0_0 = arith.constant 0 : index
    %1 = vector.load %arg1[%c0, %c0_0] : memref<16x2xi32, #tpu.memory_space<vmem>>, vector<16x1xi32>
    %2 = vector.broadcast %1 : vector<16x1xi32> to vector<16x128xi32>
    %3 = arith.cmpi eq, %0, %2 : vector<16x128xi32>
    %4 = arith.extui %3 : vector<16x128xi1> to vector<16x128xi32>
    %5 = arith.sitofp %4 : vector<16x128xi32> to vector<16x128xf32>
    %c0_1 = arith.constant 0 : index
    %c0_2 = arith.constant 0 : index
    %6 = vector.load %arg2[%c0_1, %c0_2] : memref<128x128xf32, #tpu.memory_space<vmem>>, vector<128x128xf32>
    %cst = arith.constant dense<0.000000e+00> : vector<16x128xf32>
    %7 = tpu.matmul %5, %6, %cst {dimension_numbers = #tpu.dot_dimension_numbers<[1], [0], [0], [1], [0, 0, 1, 1], [], []>, precision = #tpu.contract_precision<fp32>} : vector<16x128xf32>, vector<128x128xf32>, vector<16x128xf32> -> vector<16x128xf32>
    %c0_3 = arith.constant 0 : index
    %c0_4 = arith.constant 0 : index
    %8 = vector.load %arg3[%c0_3, %c0_4] : memref<16x128xf32, #tpu.memory_space<vmem>>, vector<16x128xf32>
    tpu.vector_store %arg3[%c0_3, %c0_4], %7 {strides = array<i32>} : memref<16x128xf32, #tpu.memory_space<vmem>>, vector<16x128xf32>,
    %c0_5 = arith.constant 0 : index
    %c1 = arith.constant 1 : index
    %9 = vector.load %arg1[%c0_5, %c1] : memref<16x2xi32, #tpu.memory_space<vmem>>, vector<16x1xi32>
    %c65_i32 = arith.constant 65 : i32
    %10 = vector.broadcast %c65_i32 : i32 to vector<16x128xi32>
    %11 = arith.cmpi slt, %0, %10 : vector<16x128xi32>
    %cst_6 = arith.constant -1.000000e+30 : f32
    %12 = vector.broadcast %cst_6 : f32 to vector<16x128xf32>
    %13 = arith.select %11, %7, %12 : vector<16x128xi1>, vector<16x128xf32>
    %cst_7 = arith.constant dense<0xFF800000> : vector<16xf32>
    %14 = vector.multi_reduction <maximumf>, %13, %cst_7 [1] : vector<16x128xf32> to vector<16xf32>
    %15 = vector.shape_cast %14 : vector<16xf32> to vector<16x1xf32>
    %16 = vector.broadcast %15 : vector<16x1xf32> to vector<16x128xf32>
    %17 = arith.subf %13, %16 : vector<16x128xf32>
    %18 = math.exp %17 : vector<16x128xf32>
    %cst_8 = arith.constant dense<0.000000e+00> : vector<16xf32>
    %19 = vector.multi_reduction <add>, %18, %cst_8 [1] : vector<16x128xf32> to vector<16xf32>
    %20 = vector.shape_cast %19 : vector<16xf32> to vector<16x1xf32>
    %21 = math.log %20 : vector<16x1xf32>
    %22 = arith.addf %15, %21 : vector<16x1xf32>
    %23 = tpu.iota {dimensions = array<i32: 0>} : vector<16x1xi32>
    %c16_i32 = arith.constant 16 : i32
    %24 = arith.muli %arg0, %c16_i32 : i32
    %25 = vector.broadcast %24 : i32 to vector<16x1xi32>
    %26 = arith.addi %25, %23 : vector<16x1xi32>
    %27 = vector.broadcast %9 : vector<16x1xi32> to vector<16x128xi32>
    %28 = arith.cmpi eq, %0, %27 : vector<16x128xi32>
    %c16_i32_9 = arith.constant 16 : i32
    %29 = vector.broadcast %c16_i32_9 : i32 to vector<16x1xi32>
    %30 = arith.cmpi slt, %26, %29 : vector<16x1xi32>
    %31 = vector.broadcast %30 : vector<16x1xi1> to vector<16x128xi1>
    %32 = arith.andi %28, %31 : vector<16x128xi1>
    %33 = vector.broadcast %22 : vector<16x1xf32> to vector<16x128xf32>
    %34 = arith.subf %33, %7 : vector<16x128xf32>
    %cst_10 = arith.constant 0.000000e+00 : f32
    %35 = vector.broadcast %cst_10 : f32 to vector<16x128xf32>
    %36 = arith.select %32, %34, %35 : vector<16x128xi1>, vector<16x128xf32>
    %cst_11 = arith.constant dense<0.000000e+00> : vector<128xf32>
    %37 = vector.multi_reduction <add>, %36, %cst_11 [0] : vector<16x128xf32> to vector<128xf32>
    %38 = vector.shape_cast %37 : vector<128xf32> to vector<1x128xf32>
    %39 = tpu.iota {dimensions = array<i32: 0>} : vector<8x128xi32>
    %c0_i32 = arith.constant 0 : i32
    %40 = vector.broadcast %c0_i32 : i32 to vector<8x128xi32>
    %41 = arith.cmpi eq, %39, %40 : vector<8x128xi32>
    %cst_12 = arith.constant 0.000000e+00 : f32
    %42 = vector.shape_cast %38 : vector<1x128xf32> to vector<1x128xf32>
    %43 = vector.broadcast %42 : vector<1x128xf32> to vector<8x128xf32>
    %44 = vector.broadcast %cst_12 : f32 to vector<8x128xf32>
    %45 = arith.select %41, %43, %44 : vector<8x128xi1>, vector<8x128xf32>
    %c0_13 = arith.constant 0 : index
    %c0_14 = arith.constant 0 : index
    %c0_15 = arith.constant 0 : index
    %46 = vector.load %arg4[%c0_13, %c0_14, %c0_15] : memref<1x8x128xf32, #tpu.memory_space<vmem>>, vector<1x8x128xf32>
    %47 = vector.shape_cast %46 : vector<1x8x128xf32> to vector<8x128xf32>
    %48 = vector.shape_cast %45 : vector<8x128xf32> to vector<1x8x128xf32>
    tpu.vector_store %arg4[%c0_13, %c0_14, %c0_15], %48 {strides = array<i32>} : memref<1x8x128xf32, #tpu.memory_space<vmem>>, vector<1x8x128xf32>,
    return
  }
  func.func @transform_0(%arg0: i32) -> (i32, i32) {
    %c0_i32 = arith.constant 0 : i32
    %c0_i32_0 = arith.constant 0 : i32
    return %arg0, %c0_i32 : i32, i32
  }
  func.func @transform_1(%arg0: i32) -> (i32, i32) {
    %c0_i32 = arith.constant 0 : i32
    %c0_i32_0 = arith.constant 0 : i32
    %c0_i32_1 = arith.constant 0 : i32
    return %c0_i32, %c0_i32_0 : i32, i32
  }
  func.func @transform_2(%arg0: i32) -> (i32, i32) {
    %c0_i32 = arith.constant 0 : i32
    %c0_i32_0 = arith.constant 0 : i32
    return %arg0, %c0_i32 : i32, i32
  }
  func.func @transform_3(%arg0: i32) -> (i32, i32, i32) {
    %c0_i32 = arith.constant 0 : i32
    %c0_i32_0 = arith.constant 0 : i32
    %c0_i32_1 = arith.constant 0 : i32
    return %arg0, %c0_i32, %c0_i32_0 : i32, i32, i32
  }
}

</mosaic_0001>

<bundles_post_ra>
// kernel: tpu_custom_call.1
= control target key start
LH: loop header
LB: loop body
LE: loop exit
PB: predicated region body
PF: predicated region fallthrough
CT: control target
= control target key end

     0   :  { %9 = vsyncpa [#allocation3], 0  ;;  %s939_s0 = inlined_call_operand.vmem [shape: s32[16,2], index: 0, kind: input, shape index: {}]   ;;  %s940_s1 = inlined_call_operand.hbm [shape: f32[128,128], index: 1, kind: input, shape index: {}]   ;;  %s941_s2 = inlined_call_operand.hbm [shape: f32[16,128], index: 2, kind: output, shape index: {0}]   ;;  %s942_s3 = inlined_call_operand.hbm [shape: f32[1,8,128], index: 3, kind: output, shape index: {1}]  }
   0x1   :  { %10 = vsyncpa [#allocation4], 0 }
   0x2   :  { %11 = vsyncpa [#allocation7], 0  ;;  %s18_s14 = sshll.u32 %s940_s1, 4  ;;  %s672_s15 = smov [#allocation2]   ;;  %s19_s14 = int_to_ptr.hbm [resolvable:$true] %s18_s14 }
   0x3   :  { %s20_s16 = sshll.u32 %s672_s15, 4  ;;  %s673_s17 = smov 128   ;;  %s21_s16 = int_to_ptr.vmem [resolvable:$true] %s20_s16 }
   0x4   :  { %s674_s18 = smov 8  }
   0x5   :  { %26 = dma.hbm_to_vmem [thread:$0]  %s19_s14, 2048, %s21_s16, [#allocation3], %s673_s17, %s673_s17, %s674_s18  }
   0x6   :  { %666 = dma.done.wait [#allocation3], 2048  }
   0x7   :  { %667 = vsyncadd [#allocation3], 4294965248  ;;  %v675_v0 = vmov 0   ;;  %v710_v1 = vld [vmem:[%s939_s0] sm:$0xff]  ;;  %v62_v2 = vld [vmem:[#allocation2 + $0x78] sm:$0xff]  ;;  %s505_s23 = sshll.u32 %s941_s2, 4  ;;  %s506_s23 = int_to_ptr.hbm [resolvable:$true] %s505_s23 }
   0x8   :  { %583 = vset.pattern.permute.xlu0 %v675_v0  ;;  %v713_v3 = vand.u32 4294901760, %v62_v2  ;;  %v61_v4 = vld [vmem:[#allocation2 + $0x70] sm:$0xff]  ;;  %v60_v5 = vld [vmem:[#allocation2 + $0x68] sm:$0xff]  ;;  %v59_v6 = vld [vmem:[#allocation2 + $0x60] sm:$0xff]  ;;  %s679_s24 = smov [#allocation5]   ;;  %s680_s2 = smov [#allocation6]  }
   0x9   :  { %36 = vperm.xlu0 %583, %v710_v1   ;;  %v715_v7 = vand.u32 4294901760, %v61_v4  ;;  %v717_v8 = vand.u32 4294901760, %v60_v5  ;;  %v719_v9 = vand.u32 4294901760, %v59_v6  ;;  %v58_v10 = vld [vmem:[#allocation2 + $0x58] sm:$0xff]  ;;  %v57_v11 = vld [vmem:[#allocation2 + $0x50] sm:$0xff]  ;;  %v56_v12 = vld [vmem:[#allocation2 + $0x48] sm:$0xff] }
   0xa   :  { %v113_v13 = vsub.f32 %v62_v2, %v713_v3  ;;  %277 = vmatpush.msra.mxu3 %v713_v3  ;;  %v723_v14 = vand.u32 4294901760, %v58_v10  ;;  %64 = vmatpush.msra.mxu0 %v713_v3  ;;  %v726_v15 = vand.u32 4294901760, %v57_v11  ;;  %v728_v16 = vand.u32 4294901760, %v56_v12  ;;  %v55_v17 = vld [vmem:[#allocation2 + $0x40] sm:$0xff]  ;;  %v743_v25 = vld [vmem:[%s939_s0 + $0x8] sm:$0xff]  ;;  %v54_v35 = vld [vmem:[#allocation2 + $0x38] sm:$0xff] }
   0xb   :  { %v119_v18 = vsub.f32 %v61_v4, %v715_v7  ;;  %v125_v19 = vsub.f32 %v60_v5, %v717_v8  ;;  %v131_v20 = vsub.f32 %v59_v6, %v719_v9  ;;  %v733_v21 = vand.u32 4294901760, %v55_v17  ;;  %v53_v39 = vld [vmem:[#allocation2 + $0x30] sm:$0xff]  ;;  %v52_v40 = vld [vmem:[#allocation2 + $0x28] sm:$0xff]  ;;  %v51_v43 = vld [vmem:[#allocation2 + $0x20] sm:$0xff]  ;;  %s503_s25 = sshll.u32 %s679_s24, 4  ;;  %s517_s26 = sshll.u32 %s680_s2, 4  ;;  %s504_s25 = int_to_ptr.vmem [resolvable:$true] %s503_s25  ;;  %s518_s26 = int_to_ptr.vmem [resolvable:$true] %s517_s26 }
   0xc   :  { %v735_v22 = vand.u32 4294901760, %v113_v13  ;;  %219 = vmatpush.msra.mxu2 %v113_v13  ;;  %279 = vmatpush.msra.mxu3 %v715_v7  ;;  %v137_v23 = vsub.f32 %v58_v10, %v723_v14  ;;  %v143_v24 = vsub.f32 %v57_v11, %v726_v15  ;;  %v149_v29 = vsub.f32 %v56_v12, %v728_v16  ;;  %v50_v50 = vld [vmem:[#allocation2 + $0x18] sm:$0xff]  ;;  %v49_v57 = vld [vmem:[#allocation2 + $0x10] sm:$0xff]  ;;  %v48_v63 = vld [vmem:[#allocation2 + $0x8] sm:$0xff]  ;;  %s519_s29 = sshll.u32 %s942_s3, 4  ;;  %s520_s29 = int_to_ptr.hbm [resolvable:$true] %s519_s29 }
   0xd   :  { %v745_v26 = vand.u32 4294901760, %v119_v18  ;;  %v747_v27 = vand.u32 4294901760, %v125_v19  ;;  %v749_v28 = vand.u32 4294901760, %v131_v20  ;;  %66 = vmatpush.msra.mxu0 %v715_v7  ;;  %v155_v34 = vsub.f32 %v55_v17, %v733_v21  ;;  %v47_v10 = vld [vmem:[#allocation2] sm:$0xff] }
   0xe   :  { %v115_v30 = vsub.f32 %v113_v13, %v735_v22  ;;  %222 = vmatpush.msra.mxu2 %v119_v18  ;;  %v754_v31 = vand.u32 4294901760, %v137_v23  ;;  %281 = vmatpush.msra.mxu3 %v717_v8  ;;  %v763_v38 = vand.u32 4294901760, %v143_v24  ;;  %v766_v42 = vand.u32 4294901760, %v149_v29 }
   0xf   :  { %v121_v32 = vsub.f32 %v119_v18, %v745_v26  ;;  %v127_v33 = vsub.f32 %v125_v19, %v747_v27  ;;  %68 = vmatpush.msra.mxu0 %v717_v8  ;;  %v133_v37 = vsub.f32 %v131_v20, %v749_v28  ;;  %v770_v46 = vand.u32 4294901760, %v54_v35 }
  0x10   :  { %v116_v36 = vand.u32 4294901760, %v115_v30  ;;  %225 = vmatpush.msra.mxu2 %v125_v19  ;;  %283 = vmatpush.msra.mxu3 %v719_v9  ;;  %v139_v45 = vsub.f32 %v137_v23, %v754_v31  ;;  %v773_v47 = vand.u32 4294901760, %v155_v34  ;;  %v776_v48 = vand.u32 4294901760, %v53_v39 }
  0x11   :  { %39 = vperm.xlu0 %583, %v743_v25   ;;  %v122_v41 = vand.u32 4294901760, %v121_v32  ;;  %70 = vmatpush.msra.mxu0 %v719_v9  ;;  %v128_v44 = vand.u32 4294901760, %v127_v33  ;;  %v778_v49 = vand.u32 4294901760, %v52_v40  ;;  %v134_v51 = vand.u32 4294901760, %v133_v37 }
  0x12   :  { %117 = vmatpush.msra.mxu1 %v116_v36  ;;  %228 = vmatpush.msra.mxu2 %v131_v20  ;;  %v145_v52 = vsub.f32 %v143_v24, %v763_v38  ;;  %v161_v53 = vsub.f32 %v54_v35, %v770_v46  ;;  %v782_v54 = vand.u32 4294901760, %v51_v43  ;;  %v151_v55 = vsub.f32 %v149_v29, %v766_v42 }
  0x13   :  { %285 = vmatpush.msra.mxu3 %v723_v14  ;;  %72 = vmatpush.msra.mxu0 %v723_v14  ;;  %v167_v56 = vsub.f32 %v53_v39, %v776_v48  ;;  %v140_v58 = vand.u32 4294901760, %v139_v45  ;;  %v173_v60 = vsub.f32 %v52_v40, %v778_v49  ;;  %v791_v61 = vand.u32 4294901760, %v50_v50 }
  0x14   :  { %123 = vmatpush.msra.mxu1 %v122_v41  ;;  %231 = vmatpush.msra.mxu2 %v137_v23  ;;  %v788_v59 = vand.u32 4294901760, %v161_v53  ;;  %v157_v62 = vsub.f32 %v155_v34, %v773_v47  ;;  %v146_v0 = vand.u32 4294901760, %v145_v52  ;;  %v179_v4 = vsub.f32 %v51_v43, %v782_v54 }
  0x15   :  { %287 = vmatpush.msra.mxu3 %v726_v15  ;;  %74 = vmatpush.msra.mxu0 %v726_v15  ;;  %v796_v2 = vand.u32 4294901760, %v167_v56  ;;  %v799_v5 = vand.u32 4294901760, %v49_v57  ;;  %v152_v6 = vand.u32 4294901760, %v151_v55  ;;  %v804_v12 = vand.u32 4294901760, %v173_v60 }
  0x16   :  { %129 = vmatpush.msra.mxu1 %v128_v44  ;;  %234 = vmatpush.msra.mxu2 %v143_v24  ;;  %v163_v11 = vsub.f32 %v161_v53, %v788_v59  ;;  %v185_v13 = vsub.f32 %v50_v50, %v791_v61  ;;  %v807_v17 = vand.u32 4294901760, %v48_v63  ;;  %v158_v18 = vand.u32 4294901760, %v157_v62 }
  0x17   :  { %289 = vmatpush.msra.mxu3 %v728_v16  ;;  %76 = vmatpush.msra.mxu0 %v728_v16  ;;  %v169_v19 = vsub.f32 %v167_v56, %v796_v2  ;;  %v812_v20 = vand.u32 4294901760, %v179_v4  ;;  %v191_v23 = vsub.f32 %v49_v57, %v799_v5  ;;  %v815_v24 = vand.u32 4294901760, %v47_v10 }
  0x18   :  { %135 = vmatpush.msra.mxu1 %v134_v51  ;;  %237 = vmatpush.msra.mxu2 %v149_v29  ;;  %v164_v29 = vand.u32 4294901760, %v163_v11  ;;  %v175_v30 = vsub.f32 %v173_v60, %v804_v12  ;;  %v820_v32 = vand.u32 4294901760, %v185_v13  ;;  %v197_v33 = vsub.f32 %v48_v63, %v807_v17 }
  0x19   :  { %291 = vmatpush.msra.mxu3 %v733_v21  ;;  %78 = vmatpush.msra.mxu0 %v733_v21  ;;  %v181_v35 = vsub.f32 %v179_v4, %v812_v20  ;;  %v826_v36 = vand.u32 4294901760, %v191_v23  ;;  %v203_v37 = vsub.f32 %v47_v10, %v815_v24 }
  0x1a   :  { %141 = vmatpush.msra.mxu1 %v140_v58  ;;  %240 = vmatpush.msra.mxu2 %v155_v34  ;;  %v170_v34 = vand.u32 4294901760, %v169_v19  ;;  %v176_v39 = vand.u32 4294901760, %v175_v30  ;;  %v187_v40 = vsub.f32 %v185_v13, %v820_v32  ;;  %v832_v41 = vand.u32 4294901760, %v197_v33 }
  0x1b   :  { %293 = vmatpush.msra.mxu3 %v770_v46  ;;  %80 = vmatpush.msra.mxu0 %v770_v46  ;;  %v182_v43 = vand.u32 4294901760, %v181_v35  ;;  %v193_v44 = vsub.f32 %v191_v23, %v826_v36  ;;  %v837_v45 = vand.u32 4294901760, %v203_v37 }
  0x1c   :  { %147 = vmatpush.msra.mxu1 %v146_v0  ;;  %243 = vmatpush.msra.mxu2 %v161_v53  ;;  %v188_v50 = vand.u32 4294901760, %v187_v40  ;;  %v199_v51 = vsub.f32 %v197_v33, %v832_v41 }
  0x1d   :  { %295 = vmatpush.msra.mxu3 %v776_v48  ;;  %82 = vmatpush.msra.mxu0 %v776_v48  ;;  %v194_v52 = vand.u32 4294901760, %v193_v44  ;;  %v205_v53 = vsub.f32 %v203_v37, %v837_v45 }
  0x1e   :  { %153 = vmatpush.msra.mxu1 %v152_v6  ;;  %246 = vmatpush.msra.mxu2 %v167_v56  ;;  %v200_v55 = vand.u32 4294901760, %v199_v51 }
  0x1f   :  { %297 = vmatpush.msra.mxu3 %v778_v49  ;;  %84 = vmatpush.msra.mxu0 %v778_v49  ;;  %v206_v56 = vand.u32 4294901760, %v205_v53 }
  0x20   :  { %159 = vmatpush.msra.mxu1 %v158_v18  ;;  %249 = vmatpush.msra.mxu2 %v173_v60 }
  0x21   :  { %299 = vmatpush.msra.mxu3 %v782_v54  ;;  %86 = vmatpush.msra.mxu0 %v782_v54 }
  0x22   :  { %165 = vmatpush.msra.mxu1 %v164_v29  ;;  %252 = vmatpush.msra.mxu2 %v179_v4 }
  0x23   :  { %301 = vmatpush.msra.mxu3 %v791_v61  ;;  %88 = vmatpush.msra.mxu0 %v791_v61 }
  0x24   :  { %171 = vmatpush.msra.mxu1 %v170_v34  ;;  %255 = vmatpush.msra.mxu2 %v185_v13 }
  0x25   :  { %303 = vmatpush.msra.mxu3 %v799_v5  ;;  %90 = vmatpush.msra.mxu0 %v799_v5 }
  0x26   :  { %177 = vmatpush.msra.mxu1 %v176_v39  ;;  %258 = vmatpush.msra.mxu2 %v191_v23  ;;  %v678_v23 = vmov 1  }
  0x27   :  { %305 = vmatpush.msra.mxu3 %v807_v17  ;;  %92 = vmatpush.msra.mxu0 %v807_v17 }
  0x28   :  { %183 = vmatpush.msra.mxu1 %v182_v43  ;;  %261 = vmatpush.msra.mxu2 %v197_v33 }
  0x29   :  { %307 = vmatpush.msra.mxu3 %v815_v24  ;;  %94 = vmatpush.msra.mxu0 %v815_v24 }
  0x2a   :  { %189 = vmatpush.msra.mxu1 %v188_v50  ;;  %264 = vmatpush.msra.mxu2 %v203_v37 }
  0x2b   :  { %558 = vmatpush.msrb.mxu3 %v713_v3  ;;  %324 = vmatpush.msrb.mxu0 %v735_v22 }
  0x2c   :  { %542 = vmatpush.msrb.mxu2 %v735_v22  ;;  %195 = vmatpush.msra.mxu1 %v194_v52 }
  0x2d   :  { %559 = vmatpush.msrb.mxu3 %v715_v7  ;;  %328 = vmatpush.msrb.mxu0 %v745_v26 }
  0x2e   :  { %543 = vmatpush.msrb.mxu2 %v745_v26  ;;  %201 = vmatpush.msra.mxu1 %v200_v55 }
  0x2f   :  { %560 = vmatpush.msrb.mxu3 %v717_v8  ;;  %332 = vmatpush.msrb.mxu0 %v747_v27 }
  0x30   :  { %544 = vmatpush.msrb.mxu2 %v747_v27  ;;  %207 = vmatpush.msra.mxu1 %v206_v56 }
  0x31   :  { %561 = vmatpush.msrb.mxu3 %v719_v9  ;;  %336 = vmatpush.msrb.mxu0 %v749_v28 }
  0x32   :  { %395 = vmatpush.msrb.mxu1 %v713_v3  ;;  %545 = vmatpush.msrb.mxu2 %v749_v28  ;;  %v31_v3 = vlaneseq }
  0x33   :  { %562 = vmatpush.msrb.mxu3 %v723_v14  ;;  %340 = vmatpush.msrb.mxu0 %v754_v31 }
  0x34   :  { %397 = vmatpush.msrb.mxu1 %v715_v7  ;;  %546 = vmatpush.msrb.mxu2 %v754_v31  ;;  %v912_v7 = vand.u32 127, %v31_v3 }
  0x35   :  { %563 = vmatpush.msrb.mxu3 %v726_v15  ;;  %344 = vmatpush.msrb.mxu0 %v763_v38 }
  0x36   :  { %399 = vmatpush.msrb.mxu1 %v717_v8  ;;  %547 = vmatpush.msrb.mxu2 %v763_v38  ;;  %vm439_vm2 = vcmp.lt.s32.totalorder %v912_v7, 65 }
  0x37   :  { %564 = vmatpush.msrb.mxu3 %v728_v16  ;;  %348 = vmatpush.msrb.mxu0 %v766_v42 }
  0x38   :  { %401 = vmatpush.msrb.mxu1 %v719_v9  ;;  %548 = vmatpush.msrb.mxu2 %v766_v42  ;;  %v676_v9 = vmov 1.0  }
  0x39   :  { %565 = vmatpush.msrb.mxu3 %v733_v21  ;;  %352 = vmatpush.msrb.mxu0 %v773_v47 }
  0x3a   :  { %403 = vmatpush.msrb.mxu1 %v723_v14  ;;  %549 = vmatpush.msrb.mxu2 %v773_v47  ;;  %v677_v14 = vmov 0.0  }
  0x3b   :  { %566 = vmatpush.msrb.mxu3 %v770_v46  ;;  %356 = vmatpush.msrb.mxu0 %v788_v59 }
  0x3c   :  { %405 = vmatpush.msrb.mxu1 %v726_v15  ;;  %550 = vmatpush.msrb.mxu2 %v788_v59 }
  0x3d   :  { %567 = vmatpush.msrb.mxu3 %v776_v48  ;;  %360 = vmatpush.msrb.mxu0 %v796_v2 }
  0x3e   :  { %407 = vmatpush.msrb.mxu1 %v728_v16  ;;  %551 = vmatpush.msrb.mxu2 %v796_v2 }
  0x3f   :  { %568 = vmatpush.msrb.mxu3 %v778_v49  ;;  %364 = vmatpush.msrb.mxu0 %v804_v12 }
  0x40   :  { %409 = vmatpush.msrb.mxu1 %v733_v21  ;;  %552 = vmatpush.msrb.mxu2 %v804_v12 }
  0x41   :  { %569 = vmatpush.msrb.mxu3 %v782_v54  ;;  %368 = vmatpush.msrb.mxu0 %v812_v20 }
  0x42   :  { %411 = vmatpush.msrb.mxu1 %v770_v46  ;;  %553 = vmatpush.msrb.mxu2 %v812_v20 }
  0x43   :  { %570 = vmatpush.msrb.mxu3 %v791_v61  ;;  %372 = vmatpush.msrb.mxu0 %v820_v32 }
  0x44   :  { %413 = vmatpush.msrb.mxu1 %v776_v48  ;;  %554 = vmatpush.msrb.mxu2 %v820_v32 }
  0x45   :  { %571 = vmatpush.msrb.mxu3 %v799_v5  ;;  %376 = vmatpush.msrb.mxu0 %v826_v36 }
  0x46   :  { %415 = vmatpush.msrb.mxu1 %v778_v49  ;;  %555 = vmatpush.msrb.mxu2 %v826_v36 }
  0x47   :  { %572 = vmatpush.msrb.mxu3 %v807_v17  ;;  %380 = vmatpush.msrb.mxu0 %v832_v41 }
  0x48   :  { %417 = vmatpush.msrb.mxu1 %v782_v54  ;;  %556 = vmatpush.msrb.mxu2 %v832_v41 }
  0x49   :  { %573 = vmatpush.msrb.mxu3 %v815_v24  ;;  %384 = vmatpush.msrb.mxu0 %v837_v45 }
  0x4a   :  { %419 = vmatpush.msrb.mxu1 %v791_v61  ;;  %557 = vmatpush.msrb.mxu2 %v837_v45 }
  0x4b   :  { %584 = vset.pattern.permute.xlu0 %v678_v23  ;;  %585 = vset.pattern.permute.xlu1 %v678_v23 }
  0x4c   :  { %421 = vmatpush.msrb.mxu1 %v799_v5  ;;  %470 = vperm.xlu0 %584, %v710_v1  }
  0x4e   :  { %423 = vmatpush.msrb.mxu1 %v807_v17 }
  0x50   :  { %425 = vmatpush.msrb.mxu1 %v815_v24 }
  0x7b   :  { %v37_v8 = vpop.permute.xlu0 %36 }
  0x7c   :  { %vm41_vm0 = vcmp.eq.s32.totalorder %v912_v7, %v37_v8 }
  0x7d   :  { %536 = vmatmul.msk.f32.vlgmr.msra.gmra.mxu1 %vm41_vm0, %v676_v9  ;;  %v534_v15 = vsel %vm41_vm0, 1.0, %v677_v14 }
  0x7e   :  { %v96_v16 = vsub.f32 %v534_v15, %v534_v15  ;;  %v463_v15 = vshrl.u32 %v31_v3, 7 }
  0x80   :  { %267 = vmatmul.f32.vlgmr.msra.gmra.mxu2 %v96_v16  ;;  %v97_v21 = vand.u32 4294901760, %v96_v16  ;;  %vm496_vm5 = vcmp.eq.s32.totalorder %v463_v15, 0 }
  0x82   :  { %311 = vmatmul.f32.vlgmr.msra.gmra.mxu3 %v97_v21  ;;  %v98_v22 = vsub.f32 %v96_v16, %v97_v21 }
  0x83   :  { %v40_v26 = vpop.permute.xlu0 %39 }
  0x84   :  { %vm42_vm1 = vcmp.eq.s32.totalorder %v912_v7, %v40_v26  ;;  %v99_v27 = vand.u32 4294901760, %v98_v22 }
  0x85   :  { %537 = vmatmul.msk.f32.gmra.mxu1 %vm42_vm1, %v676_v9  ;;  %v535_v28 = vsel %vm42_vm1, 1.0, %v677_v14 }
  0x86   :  { %100 = vmatmul.f32.vlgmr.msra.gmra.mxu0 %v99_v27  ;;  %v104_v31 = vsub.f32 %v535_v28, %v535_v28 }
  0x88   :  { %272 = vmatmul.f32.gmra.mxu2 %v104_v31  ;;  %v105_v38 = vand.u32 4294901760, %v104_v31 }
  0x8a   :  { %317 = vmatmul.f32.gmra.mxu3 %v105_v38  ;;  %v106_v42 = vsub.f32 %v104_v31, %v105_v38 }
  0x8c   :  { %v107_v46 = vand.u32 4294901760, %v106_v42 }
  0x8d   :  { %540 = vmatmul.msk.f32.vlgmr.msrb.gmra.mxu1 %vm41_vm0, %v676_v9 }
  0x8e   :  { %108 = vmatmul.f32.gmra.mxu0 %v107_v46 }
  0x90   :  { %539 = vmatmul.msk.f32.vlgmr.msrb.gmra.mxu2 %vm42_vm1, %v676_v9 }
  0x92   :  { %541 = vmatmul.msk.f32.vlgmr.msrb.gmra.mxu3 %vm42_vm1, %v676_v9 }
  0x96   :  { %538 = vmatmul.msk.f32.vlgmr.msrb.gmra.mxu0 %vm41_vm0, %v676_v9 }
  0xbe   :  { %v471_v44 = vpop.permute.xlu0 %470 }
  0xbf   :  { %vm475_vm3 = vcmp.eq.s32.totalorder %v912_v7, %v471_v44 }
  0xfa   :  { %v210_v47 = vpop.f32.mrf.mxu1 }
 0x102   :  { %v214_v57 = vpop.f32.mrf.mxu1 }
 0x103   :  { %v101_v48 = vpop.f32.mrf.mxu0  ;;  %v268_v49 = vpop.f32.mrf.mxu2 }
 0x104   :  { %v211_v58 = vadd.f32 %v210_v47, %v101_v48 }
 0x105   :  { %v312_v54 = vpop.f32.mrf.mxu3 }
 0x106   :  { %v269_v63 = vadd.f32 %v268_v49, %v211_v58 }
 0x108   :  { %v313_v2 = vadd.f32 %v312_v54, %v269_v63 }
 0x10a   :  { %v428_v12 = vpop.f32.mrf.mxu1 }
 0x10b   :  { %v109_v59 = vpop.f32.mrf.mxu0  ;;  %v273_v60 = vpop.f32.mrf.mxu2 }
 0x10c   :  { %v215_v61 = vadd.f32 %v214_v57, %v109_v59 }
 0x10d   :  { %v318_v62 = vpop.f32.mrf.mxu3 }
 0x10e   :  { %v274_v0 = vadd.f32 %v273_v60, %v215_v61 }
 0x110   :  { %v319_v4 = vadd.f32 %v318_v62, %v274_v0 }
 0x113   :  { %v387_v5 = vpop.f32.mrf.mxu0  ;;  %v391_v6 = vpop.f32.mrf.mxu2 }
 0x114   :  { %v388_v10 = vadd.f32 %v387_v5, %v313_v2  ;;  %v392_v11 = vadd.f32 %v391_v6, %v319_v4 }
 0x115   :  { %v432_v13 = vpop.f32.mrf.mxu3 }
 0x116   :  { %v429_v17 = vadd.f32 %v428_v12, %v388_v10  ;;  %v433_v18 = vadd.f32 %v432_v13, %v392_v11 }
 0x118   :  { %435 = vst [vmem:[#allocation5] sm:$0xff] %v429_v17  ;;  %v440_v19 = vsel %vm439_vm2, %v429_v17, -1e+30  ;;  %v441_v20 = vsel %vm439_vm2, %v433_v18, -1e+30 }
 0x119   :  { %436 = vst [vmem:[#allocation5 + $0x8] sm:$0xff] %v433_v18  ;;  %442 = vmax.xlane.f32.xlu1 %v440_v19 }
 0x11a   :  { %511 = dma.vmem_to_hbm [thread:$0]  %s504_s25, 256, %s506_s23, [#allocation4], %s673_s17, %s673_s17, %s674_s18  }
 0x121   :  { %444 = vmax.xlane.f32.xlu1 %v441_v20 }
 0x13a   :  { %473 = vperm.xlu1 %585, %v743_v25  }
 0x18c   :  { %v443_v24 = vpop.xlane.xlu1 %442 }
 0x18d   :  { %v446_v29 = vsub.f32 %v440_v19, %v443_v24 }
 0x18f   :  { %v448_v30 = vmul.f32 1.442695, %v446_v29 }
 0x191   :  { %586 = vpow2.f32 %v448_v30 }
 0x194   :  { %v445_v32 = vpop.xlane.xlu1 %444 }
 0x195   :  { %v447_v33 = vsub.f32 %v441_v20, %v445_v32 }
 0x197   :  { %v587_v34 = vpop.eup %586  ;;  %v450_v35 = vmul.f32 1.442695, %v447_v33 }
 0x198   :  { %452 = vadd.xlane.f32.xlu2 %v587_v34 }
 0x199   :  { %588 = vpow2.f32 %v450_v35 }
 0x19f   :  { %v589_v36 = vpop.eup %588 }
 0x1a0   :  { %454 = vadd.xlane.f32.xlu2 %v589_v36 }
 0x1ac   :  { %v474_v45 = vpop.permute.xlu1 %473 }
 0x1ad   :  { %vm476_vm4 = vcmp.eq.s32.totalorder %v912_v7, %v474_v45 }
 0x20b   :  { %v453_v1 = vpop.xlane.xlu2 %452 }
 0x20c   :  { %590 = vlog2.f32 %v453_v1 }
 0x212   :  { %v591_v25 = vpop.eup %590 }
 0x213   :  { %v455_v37 = vpop.xlane.xlu2 %454  ;;  %v457_v39 = vmul.f32 0.6931472, %v591_v25 }
 0x214   :  { %592 = vlog2.f32 %v455_v37 }
 0x215   :  { %v460_v40 = vadd.f32 %v457_v39, %v443_v24 }
 0x217   :  { %v485_v51 = vsub.f32 %v460_v40, %v429_v17 }
 0x219   :  { %v487_v53 = vsel %vm475_vm3, %v485_v51, 0.0 }
 0x21a   :  { %v593_v41 = vpop.eup %592 }
 0x21b   :  { %v459_v43 = vmul.f32 0.6931472, %v593_v41 }
 0x21d   :  { %v461_v50 = vadd.f32 %v459_v43, %v445_v32 }
 0x21f   :  { %v486_v52 = vsub.f32 %v461_v50, %v433_v18 }
 0x221   :  { %v488_v55 = vsel %vm476_vm4, %v486_v52, 0.0 }
 0x222   :  { %v489_v56 = vadd.f32 %v488_v55, %v487_v53 }
 0x224   :  { %v490_v8 = vrot.slane %v489_v56, 4 }
 0x226   :  { %v491_v9 = vadd.f32 %v490_v8, %v489_v56 }
 0x228   :  { %v492_v14 = vrot.slane %v491_v9, 2 }
 0x22a   :  { %v493_v16 = vadd.f32 %v492_v14, %v491_v9 }
 0x22c   :  { %v494_v21 = vrot.slane %v493_v16, 1 }
 0x22e   :  { %v495_v22 = vadd.f32 %v494_v21, %v493_v16 }
 0x230   :  { %v497_v7 = vsel %vm496_vm5, %v495_v22, 0.0 }
 0x231   :  { %498 = vst [vmem:[#allocation6] sm:$0xff] %v497_v7 }
 0x232   :  { %522 = dma.vmem_to_hbm [thread:$0]  %s518_s26, 128, %s520_s29, [#allocation7]  }
 0x233   :  { %668 = dma.done.wait [#allocation4], 256  }
 0x234   :  { %669 = vsyncadd [#allocation4], 4294967040 }
 0x235   :  { %670 = dma.done.wait [#allocation7], 128  }
 0x236   :  { %671 = vsyncadd [#allocation7], 4294967168 }
 0x237   :  { %531 = vsyncpa [#allocation3], 1 }
 0x238   :  { %532 = vsyncpa [#allocation4], 1 }
 0x239   :  { %533 = vsyncpa [#allocation7], 1 }

</bundles_post_ra>
